<compile_context>
chip_gen: v7x
topology: tpu7x:2x2x1
jax: 0.10.0
libtpu: 0.0.40
codegen_flags: <defaults>
</compile_context>

<pallas_src>
import functools

import jax
import jax.numpy as jnp
from jax.experimental import pallas as pl
from jax.experimental.pallas import tpu as pltpu


def _round_up(x, m):
    return ((x + m - 1) // m) * m


def _mlp_kernel(ctx_ref, act_ref, w1c_ref, w1a_ref, b1_ref, w2t_ref, b2_ref, o_ref):
    # fc1 on the fused (context | action) input, expressed as two MXU matmuls so the
    # concatenated matrix is never materialized in HBM.
    h = jnp.dot(ctx_ref[...], w1c_ref[...], preferred_element_type=jnp.float32)
    h = h + jnp.dot(act_ref[...], w1a_ref[...], preferred_element_type=jnp.float32)
    h = jnp.maximum(h + b1_ref[...], 0.0)                       # (TB, H) f32

    # fc2 with a lane-dense result: contract H of (1,H) with H of (TB,H) -> (1, TB),
    # avoiding a width-1 (masked-store) output tile.
    r = jnp.einsum("oh,bh->ob", w2t_ref[...], h,
                   preferred_element_type=jnp.float32)          # (1, TB)
    r = r + b2_ref[0]                                           # scalar bias from SMEM
    o_ref[...] = jax.nn.sigmoid(r).astype(o_ref.dtype)


def neural_network_forward(context, action, params, *, block_rows=512, use_bf16=False):
    """Forward pass matching NeuralNetwork.forward(context, action) -> (B,) rewards."""
    w1, b1, w2, b2 = params            # w1: (D, H), b1: (H,), w2: (H, 1), b2: (1,)
    B, Dc = context.shape
    Da = action.shape[1]
    D = Dc + Da
    H = w1.shape[1]
    assert w1.shape[0] == D, "fc1 weight must have shape (context_dim + num_arms*action_dim, hidden)"

    # Split fc1 weights so the concat is fused into the kernel.
    w1c = w1[:Dc, :]
    w1a = w1[Dc:, :]

    # Batch tiling: big tiles for streaming efficiency, padded to a clean multiple.
    TB = min(block_rows, _round_up(B, 8))
    B_pad = _round_up(B, TB)
    G = B_pad // TB

    in_dtype = jnp.bfloat16 if use_bf16 else jnp.float32
    ctx = context.astype(in_dtype)
    act = action.astype(in_dtype)
    w1c = w1c.astype(in_dtype)
    w1a = w1a.astype(in_dtype)
    if B_pad != B:
        pad = B_pad - B
        ctx = jnp.pad(ctx, ((0, pad), (0, 0)))
        act = jnp.pad(act, ((0, pad), (0, 0)))

    b1_2d = b1.reshape(1, H).astype(jnp.float32)        # (1, H)
    w2t = w2.reshape(H, 1).T.astype(jnp.float32)        # (1, H)  (transposed fc2 weight)
    b2_s = b2.reshape(1).astype(jnp.float32)            # (1,) scalar, lives in SMEM

    bytes_accessed = int(ctx.nbytes + act.nbytes + w1c.nbytes + w1a.nbytes
                         + b1_2d.nbytes + w2t.nbytes + b2_s.nbytes + 4 * B_pad)

    out = pl.pallas_call(
        _mlp_kernel,
        out_shape=jax.ShapeDtypeStruct((1, B_pad), jnp.float32),
        grid=(G,),
        in_specs=[
            pl.BlockSpec((TB, Dc), lambda i: (i, 0)),    # context rows, streamed
            pl.BlockSpec((TB, Da), lambda i: (i, 0)),    # action rows, streamed
            pl.BlockSpec((Dc, H), lambda i: (0, 0)),     # w1_ctx, VMEM-resident
            pl.BlockSpec((Da, H), lambda i: (0, 0)),     # w1_act, VMEM-resident
            pl.BlockSpec((1, H), lambda i: (0, 0)),      # b1
            pl.BlockSpec((1, H), lambda i: (0, 0)),      # w2^T
            pl.BlockSpec(memory_space=pltpu.MemorySpace.SMEM),   # b2 scalar
        ],
        out_specs=pl.BlockSpec((1, TB), lambda i: (0, i)),       # lane-dense output row
        compiler_params=pltpu.CompilerParams(
            dimension_semantics=("parallel",),
        ),
        cost_estimate=pl.CostEstimate(
            flops=2 * B_pad * D * H + 2 * B_pad * H,
            transcendentals=B_pad,
            bytes_accessed=bytes_accessed,
        ),
    )(ctx, act, w1c, w1a, b1_2d, w2t, b2_s)

    return out.reshape(-1)[:B]                            # (B,)


def init_params(key, context_dim, num_arms, action_dim, hidden_size):
    """Deterministic init mirroring nn.Linear default (uniform +/- 1/sqrt(fan_in))."""
    input_dim = context_dim + num_arms * action_dim
    k1, k2, k3, k4 = jax.random.split(key, 4)
    bound1 = 1.0 / jnp.sqrt(input_dim)
    bound2 = 1.0 / jnp.sqrt(hidden_size)
    # weights stored as (in_features, out_features)
    w1 = jax.random.uniform(k1, (input_dim, hidden_size), jnp.float32, -bound1, bound1)
    b1 = jax.random.uniform(k2, (hidden_size,), jnp.float32, -bound1, bound1)
    w2 = jax.random.uniform(k3, (hidden_size, 1), jnp.float32, -bound2, bound2)
    b2 = jax.random.uniform(k4, (1,), jnp.float32, -bound2, bound2)
    return w1, b1, w2, b2


if __name__ == "__main__":
    # Small shapes consistent with the module.
    context_dim = 8
    num_arms = 4
    action_dim = 2
    hidden_size = 32
    batch = 8

    key = jax.random.PRNGKey(0)
    kp, kc, ka = jax.random.split(key, 3)

    params = init_params(kp, context_dim, num_arms, action_dim, hidden_size)
    context = jax.random.normal(kc, (batch, context_dim), jnp.float32)
    action = jax.random.normal(ka, (batch, num_arms * action_dim), jnp.float32)

    fwd = jax.jit(functools.partial(neural_network_forward, block_rows=512, use_bf16=False))
    reward = fwd(context, action, params)
    reward = jax.block_until_ready(reward)

    # Reference check in plain JAX (mirrors the PyTorch forward).
    w1, b1, w2, b2 = params
    combined = jnp.concatenate([context, action], axis=1)
    ref = jax.nn.sigmoid(jnp.maximum(combined @ w1 + b1, 0.0) @ w2 + b2).reshape(-1)

    assert reward.shape == (batch,)
    assert jnp.allclose(reward, ref, atol=1e-5, rtol=1e-5)

    print("KERNEL_OK")
</pallas_src>

<mosaic_0001>
module attributes {stable_mosaic.version = 11 : i64} {
  func.func @_mlp_kernel(%arg0: i32, %arg1: memref<8x8xf32, #tpu.memory_space<vmem>>, %arg2: memref<8x8xf32, #tpu.memory_space<vmem>>, %arg3: memref<8x32xf32, #tpu.memory_space<vmem>>, %arg4: memref<8x32xf32, #tpu.memory_space<vmem>>, %arg5: memref<1x32xf32, #tpu.memory_space<vmem>>, %arg6: memref<1x32xf32, #tpu.memory_space<vmem>>, %arg7: memref<1xf32, #tpu.memory_space<smem>>, %arg8: memref<1x8xf32, #tpu.memory_space<vmem>>) attributes {dimension_semantics = [#tpu.dimension_semantics<parallel>], iteration_bounds = array<i64: 1>, scalar_prefetch = 0 : i64, scratch_operands = 0 : i64, tpu.core_type = #tpu.core_type<tc>, window_params = [{transform_indices = @transform_0, window_bounds = array<i64: 8, 8>}, {transform_indices = @transform_1, window_bounds = array<i64: 8, 8>}, {pipeline_mode = #tpu.pipeline_mode<synchronous>, transform_indices = @transform_2, window_bounds = array<i64: 8, 32>}, {pipeline_mode = #tpu.pipeline_mode<synchronous>, transform_indices = @transform_3, window_bounds = array<i64: 8, 32>}, {pipeline_mode = #tpu.pipeline_mode<synchronous>, transform_indices = @transform_4, window_bounds = array<i64: 1, 32>}, {pipeline_mode = #tpu.pipeline_mode<synchronous>, transform_indices = @transform_5, window_bounds = array<i64: 1, 32>}, {transform_indices = @transform_6, window_bounds = array<i64: 1>}, {transform_indices = @transform_7, window_bounds = array<i64: 1, 8>}]} {
    %c0 = arith.constant 0 : index
    %c0_0 = arith.constant 0 : index
    %0 = vector.load %arg1[%c0, %c0_0] : memref<8x8xf32, #tpu.memory_space<vmem>>, vector<8x8xf32>
    %c0_1 = arith.constant 0 : index
    %c0_2 = arith.constant 0 : index
    %1 = vector.load %arg3[%c0_1, %c0_2] : memref<8x32xf32, #tpu.memory_space<vmem>>, vector<8x32xf32>
    %cst = arith.constant dense<0.000000e+00> : vector<8x32xf32>
    %2 = tpu.matmul %0, %1, %cst {dimension_numbers = #tpu.dot_dimension_numbers<[1], [0], [0], [1], [0, 0, 1, 1], [], []>} : vector<8x8xf32>, vector<8x32xf32>, vector<8x32xf32> -> vector<8x32xf32>
    %c0_3 = arith.constant 0 : index
    %c0_4 = arith.constant 0 : index
    %3 = vector.load %arg2[%c0_3, %c0_4] : memref<8x8xf32, #tpu.memory_space<vmem>>, vector<8x8xf32>
    %c0_5 = arith.constant 0 : index
    %c0_6 = arith.constant 0 : index
    %4 = vector.load %arg4[%c0_5, %c0_6] : memref<8x32xf32, #tpu.memory_space<vmem>>, vector<8x32xf32>
    %cst_7 = arith.constant dense<0.000000e+00> : vector<8x32xf32>
    %5 = tpu.matmul %3, %4, %cst_7 {dimension_numbers = #tpu.dot_dimension_numbers<[1], [0], [0], [1], [0, 0, 1, 1], [], []>} : vector<8x8xf32>, vector<8x32xf32>, vector<8x32xf32> -> vector<8x32xf32>
    %6 = arith.addf %2, %5 : vector<8x32xf32>
    %c0_8 = arith.constant 0 : index
    %c0_9 = arith.constant 0 : index
    %7 = vector.load %arg5[%c0_8, %c0_9] : memref<1x32xf32, #tpu.memory_space<vmem>>, vector<1x32xf32>
    %8 = vector.broadcast %7 : vector<1x32xf32> to vector<8x32xf32>
    %9 = arith.addf %6, %8 : vector<8x32xf32>
    %cst_10 = arith.constant 0.000000e+00 : f32
    %10 = vector.broadcast %cst_10 : f32 to vector<8x32xf32>
    %11 = arith.maximumf %9, %10 : vector<8x32xf32>
    %c0_11 = arith.constant 0 : index
    %c0_12 = arith.constant 0 : index
    %12 = vector.load %arg6[%c0_11, %c0_12] : memref<1x32xf32, #tpu.memory_space<vmem>>, vector<1x32xf32>
    "tpu.trace_start"() <{level = 10 : i32, message = "oh,bh->ob"}> : () -> ()
    %cst_13 = arith.constant dense<0.000000e+00> : vector<1x8xf32>
    %13 = tpu.matmul %12, %11, %cst_13 {dimension_numbers = #tpu.dot_dimension_numbers<[1], [1], [0], [0], [0, 0, 1, 0], [], []>} : vector<1x32xf32>, vector<8x32xf32>, vector<1x8xf32> -> vector<1x8xf32>
    "tpu.trace_stop"() : () -> ()
    %c0_14 = arith.constant 0 : index
    %14 = memref.load %arg7[%c0_14] : memref<1xf32, #tpu.memory_space<smem>>
    %15 = vector.broadcast %14 : f32 to vector<1x8xf32>
    %16 = arith.addf %13, %15 : vector<1x8xf32>
    %17 = arith.negf %16 : vector<1x8xf32>
    %18 = math.exp %17 : vector<1x8xf32>
    %cst_15 = arith.constant 1.000000e+00 : f32
    %19 = vector.broadcast %cst_15 : f32 to vector<1x8xf32>
    %20 = arith.addf %19, %18 : vector<1x8xf32>
    %21 = arith.divf %19, %20 : vector<1x8xf32>
    %c0_16 = arith.constant 0 : index
    %c0_17 = arith.constant 0 : index
    %22 = vector.load %arg8[%c0_16, %c0_17] : memref<1x8xf32, #tpu.memory_space<vmem>>, vector<1x8xf32>
    tpu.vector_store %arg8[%c0_16, %c0_17], %21 {strides = array<i32>} : memref<1x8xf32, #tpu.memory_space<vmem>>, vector<1x8xf32>,
    return
  }
  func.func @transform_0(%arg0: i32) -> (i32, i32) {
    %c0_i32 = arith.constant 0 : i32
    %c0_i32_0 = arith.constant 0 : i32
    return %arg0, %c0_i32 : i32, i32
  }
  func.func @transform_1(%arg0: i32) -> (i32, i32) {
    %c0_i32 = arith.constant 0 : i32
    %c0_i32_0 = arith.constant 0 : i32
    return %arg0, %c0_i32 : i32, i32
  }
  func.func @transform_2(%arg0: i32) -> (i32, i32) {
    %c0_i32 = arith.constant 0 : i32
    %c0_i32_0 = arith.constant 0 : i32
    %c0_i32_1 = arith.constant 0 : i32
    return %c0_i32, %c0_i32_0 : i32, i32
  }
  func.func @transform_3(%arg0: i32) -> (i32, i32) {
    %c0_i32 = arith.constant 0 : i32
    %c0_i32_0 = arith.constant 0 : i32
    %c0_i32_1 = arith.constant 0 : i32
    return %c0_i32, %c0_i32_0 : i32, i32
  }
  func.func @transform_4(%arg0: i32) -> (i32, i32) {
    %c0_i32 = arith.constant 0 : i32
    %c0_i32_0 = arith.constant 0 : i32
    %c0_i32_1 = arith.constant 0 : i32
    return %c0_i32, %c0_i32_0 : i32, i32
  }
  func.func @transform_5(%arg0: i32) -> (i32, i32) {
    %c0_i32 = arith.constant 0 : i32
    %c0_i32_0 = arith.constant 0 : i32
    %c0_i32_1 = arith.constant 0 : i32
    return %c0_i32, %c0_i32_0 : i32, i32
  }
  func.func @transform_6(%arg0: i32) -> i32 {
    %c0_i32 = arith.constant 0 : i32
    %c0_i32_0 = arith.constant 0 : i32
    return %c0_i32 : i32
  }
  func.func @transform_7(%arg0: i32) -> (i32, i32) {
    %c0_i32 = arith.constant 0 : i32
    %c0_i32_0 = arith.constant 0 : i32
    return %c0_i32, %arg0 : i32, i32
  }
}

</mosaic_0001>

<bundles_post_ra>
// kernel: neural_network_forward.1
= control target key start
LH: loop header
LB: loop body
LE: loop exit
PB: predicated region body
PF: predicated region fallthrough
CT: control target
= control target key end

     0   :  { %v348_v2 = vmov 0.0   ;;  %vm32_vm0 = vcmask 64512   ;;  %s424_s0 = inlined_call_operand.vmem [shape: f32[8,8], index: 0, kind: input, shape index: {}]   ;;  %s425_s1 = inlined_call_operand.vmem [shape: f32[8,8], index: 1, kind: input, shape index: {}]   ;;  %s426_s2 = inlined_call_operand.vmem [shape: f32[8,32], index: 2, kind: input, shape index: {}]   ;;  %s427_s3 = inlined_call_operand.vmem [shape: f32[8,32], index: 3, kind: input, shape index: {}]   ;;  %s428_s4 = inlined_call_operand.vmem [shape: f32[1,32], index: 4, kind: input, shape index: {}]   ;;  %s429_s5 = inlined_call_operand.vmem [shape: f32[1,32], index: 5, kind: input, shape index: {}]   ;;  %s430_s6 = inlined_call_operand.<no memory space> [shape: f32[1], index: 6, kind: input, shape index: {}]   ;;  %s431_s7 = inlined_call_operand.hbm [shape: f32[1,8], index: 7, kind: output, shape index: {}]  }
   0x1   :  { %v31_v0 = vld [vmem:[%s427_s3] sm:$0xff]  ;;  %302 = vmatprep.subr.mxu0 %v348_v2  ;;  %307 = vmatprep.subr.mxu1 %v348_v2 }
   0x2   :  { %v29_v1 = vld [vmem:[%s426_s2] sm:$0xff] }
   0x3   :  { %v30_v3 = vld [vmem:[%s425_s1] sm:$0xff] }
   0x4   :  { %v28_v4 = vld [vmem:[%s424_s0] sm:$0xff] }
   0x5   :  { %13 = vsyncpa [#allocation4], 0  ;;  %303 = vmatpush3.msra.mxu0 %v31_v0  ;;  %vm349_vm1 = vmmov 0   ;;  %308 = vmatpush3.msra.mxu1 %v29_v1  ;;  %v292_v7 = vld [vmem:[%s428_s4] ss:$0 sm:$0xff]  ;;  %vm191_vm2 = vcmask 261120   ;;  %v190_v14 = vstv %s430_s6 }
   0x6   :  { %304 = vmatprep.mubr.msk.f32.mxu0 %vm349_vm1, %v348_v2  ;;  %309 = vmatprep.mubr.msk.f32.mxu1 %vm349_vm1, %v348_v2  ;;  %v188_v13 = vld [vmem:[%s429_s5] sm:$0x1]  ;;  %s350_s4 = smov [#allocation3]   ;;  %vm274_vm3 = vcmask 57344  }
   0x7   :  { %305 = vmatmul.mubr.msk.f32.vlgmr.msra.gmra.mrb[0].mxu0 %vm32_vm0, %v30_v3  ;;  %310 = vmatmul.mubr.msk.f32.vlgmr.msra.gmra.mrb[0].mxu1 %vm32_vm0, %v28_v4  ;;  %s282_s11 = sshll.u32 %s350_s4, 4  ;;  %s283_s11 = int_to_ptr.vmem [resolvable:$true] %s282_s11 }
   0x8   :  { %312 = vmatprep.subr.mxu0 %v348_v2  ;;  %314 = vmatprep.mubr.msk.f32.mxu0 %vm349_vm1, %v348_v2  ;;  %s324_s5 = scalar_lea.vmem %s283_s11, 16  ;;  %s328_s12 = scalar_lea.vmem %s283_s11, 32 }
   0x9   :  { %p325_p0 = scmp.ne.s32.totalorder %s283_s11, %s324_s5  ;;  %p329_p1 = scmp.lt.s32.totalorder %s283_s11, %s283_s11 }
   0xa   :  { %p330_p2 = scmp.lt.s32.totalorder %s328_s12, %s324_s5 }
   0xc   :  { %p331_p3 = por %p330_p2, %p329_p1 }
   0xe   :  { %p332_p4 = pnand %p331_p3, %p325_p0 }
  0xda   :  { %v102_v5 = vpop.f32.mrb[0].mxu0  ;;  %v175_v6 = vpop.f32.mrb[0].mxu1 }
  0xdb   :  { %v176_v8 = vadd.f32 %v175_v6, %v102_v5  ;;  %v306_v9 = vpop.f32.mrb[1].mxu0  ;;  %v311_v10 = vpop.f32.mrb[1].mxu1 }
  0xdd   :  { %v186_v11 = vadd.f32 %v292_v7, %v176_v8 }
  0xdf   :  { %v187_v12 = vmax.f32 %v186_v11, 0.0 }
  0xe1   :  { %313 = vmatpush3.xpose.msk.msra.mxu0 %vm191_vm2, %v187_v12 }
  0xe4   :  { %315 = vmatmul.mubr.msk.f32.vlgmr.msra.gmra.mrb[2].mxu0 %vm191_vm2, %v188_v13 }
 0x1b7   :  { %v264_v15 = vpop.f32.mrb[2].mxu0 }
 0x1b8   :  { %v265_v16 = vadd.f32 %v264_v15, %v190_v14  ;;  %v316_v17 = vpop.f32.mrb[3].mxu0 }
 0x1ba   :  { %v295_v18 = vmul.f32 -1.442695, %v265_v16 }
 0x1bc   :  { %320 = vpow2.f32 %v295_v18 }
 0x1c6   :  { %v321_v19 = vpop.eup %320 }
 0x1c7   :  { %v271_v20 = vadd.f32 1.0, %v321_v19 }
 0x1c9   :  { %322 = vrcp.f32 %v271_v20 }
 0x1d3   :  { %v323_v21 = vpop.eup %322 }
 0x1d4   :  { %275 = vst.msk [vmem:[#allocation3] sm:$0x1] %vm274_vm3, %v323_v21 }
 0x1d5   :  { %335 = shalt.err (!%p332_p4)
}
 0x1d6   :  { %s336_s14 = scalar_lea.hbm %s431_s7, 16 }
 0x1d7   :  { %p337_p5 = scmp.ne.s32.totalorder %s431_s7, %s336_s14  ;;  %p340_p6 = scmp.lt.u32.totalorder %s336_s14, %s431_s7 }
 0x1d9   :  { %p342_p7 = pnand %p340_p6, %p337_p5 }
 0x1db   :  { %345 = shalt.err (!%p342_p7)
}
 0x1dc   :  { %285 = dma.vmem_to_hbm [thread:$0]  %s283_s11, 16, %s431_s7, [#allocation4]  }
 0x1dd   :  { %346 = dma.done.wait [#allocation4], 16  }
 0x1de   :  { %347 = vsyncadd [#allocation4], 4294967280 }
 0x1df   :  { %289 = vsyncpa [#allocation4], 1 }

</bundles_post_ra>
